<compile_context>
chip_gen: v6e
topology: v6e:2x2x1
jax: 0.10.0
libtpu: 0.0.40
codegen_flags: <defaults>
</compile_context>

<pallas_src>
import functools

import jax
import jax.numpy as jnp
from jax.experimental import pallas as pl
from jax.experimental.pallas import tpu as pltpu


_BIG = 1e30  # sentinel squared distance for padded points


def _round_up(x, m):
    return (x + m - 1) // m * m


# ---------------------------------------------------------------------------
# Kernel 1: tiled extended-Chamfer min squared distances.
#
#   d[m, n] = ||p[m] - gt[n]||^2 comes out of a single K=8 MXU matmul of
#   augmented operands:
#       p_aug[m, :]  = [-2 px, -2 py, -2 pz, |p|^2, 1, 0, 0, 0]   (B, Mp, 8)
#       gt_aug[:, n] = [   gx,    gy,    gz,     1, |g|^2, 0,0,0] (B, 8, Np)
#
#   grid = (B, M_tiles, N_tiles), N innermost ("arbitrary"):
#     * dp[m] = min_n d : per N-tile VPU min-tree over 128-lane column groups
#       into a (TM, 128) running-min scratch; one XLU lane reduce + store at
#       the last N tile.
#     * dg[n] = min_m d : per-M-tile sublane reduce written to a
#       (B, M_tiles, 1, Np) partial output, min-combined on the host (tiny),
#       so B and M-tile axes both stay "parallel" (megacore / dual-TC).
# ---------------------------------------------------------------------------
def _chamfer_kernel(p_ref, gt_ref, dp_ref, dgp_ref, accm_ref):
    j = pl.program_id(2)
    nj = pl.num_programs(2)

    p_mk = p_ref[0]                       # (TM, 8)  M on sublanes, K on lanes
    gt_kn = gt_ref[0]                     # (8, TN)  K on sublanes, N on lanes
    # (TM, 8) @ (8, TN) -> full squared-distance tile straight off the MXU.
    d = jnp.dot(p_mk, gt_kn, preferred_element_type=jnp.float32)

    # dg partial for this M tile: sublane (XLU) reduce over TM, lane-dense row.
    dgp_ref[0, 0, 0, :] = jnp.min(d, axis=0)

    # dp partial: VPU min-tree across 128-lane column groups -> (TM, 128).
    tn = d.shape[1]
    part = d[:, 0:128]
    for c in range(1, tn // 128):         # static unroll, pure VPU
        part = jnp.minimum(part, d[:, c * 128:(c + 1) * 128])

    @pl.when(j == 0)
    def _():
        accm_ref[...] = part

    @pl.when(j != 0)
    def _():
        accm_ref[...] = jnp.minimum(accm_ref[...], part)

    @pl.when(j == nj - 1)
    def _():
        dp_ref[0, 0, :] = jnp.min(accm_ref[...], axis=1)


def chamfer_min_dists(pc_gt, pc_p, *, tm=512, tn=2048):
    """Returns (d_p2gt (B, M), d_gt2p (B, N)): min squared distances."""
    B, N, _ = pc_gt.shape
    _, M, _ = pc_p.shape

    TM = min(tm, _round_up(M, 128))
    TN = min(tn, _round_up(N, 128))
    Mp = _round_up(M, TM)
    Np = _round_up(N, TN)
    n_i = Mp // TM
    n_j = Np // TN

    p = pc_p.astype(jnp.float32)                   # (B, M, 3)
    g = pc_gt.astype(jnp.float32)                  # (B, N, 3)
    p_sq = jnp.sum(p * p, axis=-1, keepdims=True)  # (B, M, 1)
    g_sq = jnp.sum(g * g, axis=-1)                 # (B, N)

    # LHS (B, Mp, 8): rows [-2px, -2py, -2pz, |p|^2, 1, 0, 0, 0]
    p_rows = jnp.concatenate(
        [-2.0 * p, p_sq, jnp.ones((B, M, 1), jnp.float32),
         jnp.zeros((B, M, 3), jnp.float32)], axis=-1)            # (B, M, 8)
    p_aug = jnp.pad(p_rows, ((0, 0), (0, Mp - M), (0, 0)))
    if Mp > M:   # padded predicted points: far from every real GT point
        p_aug = p_aug.at[:, M:, 3].set(_BIG)

    # RHS (B, 8, Np): columns [gx, gy, gz, 1, |g|^2, 0, 0, 0]  (lane-dense)
    g_t = jnp.transpose(g, (0, 2, 1))                            # (B, 3, N)
    g_rows = jnp.concatenate(
        [g_t, jnp.ones((B, 1, N), jnp.float32), g_sq[:, None, :],
         jnp.zeros((B, 3, N), jnp.float32)], axis=1)             # (B, 8, N)
    g_aug = jnp.pad(g_rows, ((0, 0), (0, 0), (0, Np - N)))
    if Np > N:   # padded GT points: far from every real predicted point
        g_aug = g_aug.at[:, 4, N:].set(_BIG)

    dp, dgp = pl.pallas_call(
        _chamfer_kernel,
        out_shape=(jax.ShapeDtypeStruct((B, 1, Mp), jnp.float32),
                   jax.ShapeDtypeStruct((B, n_i, 1, Np), jnp.float32)),
        grid=(B, n_i, n_j),
        in_specs=[pl.BlockSpec((1, TM, 8), lambda b, i, j: (b, i, 0)),
                  pl.BlockSpec((1, 8, TN), lambda b, i, j: (b, 0, j))],
        out_specs=(pl.BlockSpec((1, 1, TM), lambda b, i, j: (b, 0, i)),
                   pl.BlockSpec((1, 1, 1, TN), lambda b, i, j: (b, i, 0, j))),
        scratch_shapes=[pltpu.VMEM((TM, 128), jnp.float32)],
        compiler_params=pltpu.CompilerParams(
            dimension_semantics=("parallel", "parallel", "arbitrary"),
            vmem_limit_bytes=32 * 1024 * 1024),
    )(p_aug, g_aug)

    d_p2gt = jnp.maximum(dp[:, 0, :M], 0.0)
    d_gt2p = jnp.maximum(jnp.min(dgp[:, :, 0, :N], axis=1), 0.0)
    return d_p2gt, d_gt2p


# ---------------------------------------------------------------------------
# Kernel 2: scaled-isometry (first-fundamental-form) per-batch moment sums,
# streamed over M (grid, "arbitrary") with the sums accumulated in the
# resident (B, 16) output block:
#   col 0: sum (E-G)^2 * inv        col 5: sum inv
#   col 1: sum E^2 * inv            col 6: sum F^2 * inv
#   col 2: sum E   * inv            col 7: sum sqrt(max(EG - F^2, 0))
#   col 3: sum G^2 * inv            col 8: sum E
#   col 4: sum G   * inv            col 9: sum G
# where inv = 1 / (max(EG - F^2, 0) + eps).  Padded M columns are masked.
# muE / muG are reconstructed on the host from sum(E), sum(G).
# ---------------------------------------------------------------------------
_OUT_W = 16  # padded output width (>= 10 used columns)


def _sciso_kernel(fff_ref, out_ref, *, eps, m_valid, tms):
    t = pl.program_id(0)

    E = fff_ref[:, 0, :]                  # (B, TMS)
    F = fff_ref[:, 1, :]
    G = fff_ref[:, 2, :]

    cols = jax.lax.broadcasted_iota(jnp.int32, (1, tms), 1) + t * tms
    mask = (cols < m_valid).astype(jnp.float32)        # (1, TMS), bcast over B

    A2 = jnp.maximum(E * G - F * F, 0.0)
    inv = mask / (A2 + eps)               # masked, exact reciprocal
    Einv = E * inv
    Ginv = G * inv
    dEG = E - G
    A = jnp.sqrt(A2) * mask
    Em = E * mask
    Gm = G * mask

    sums = [
        jnp.sum(dEG * dEG * inv, axis=1, keepdims=True),   # 0
        jnp.sum(E * Einv, axis=1, keepdims=True),          # 1
        jnp.sum(Einv, axis=1, keepdims=True),              # 2
        jnp.sum(G * Ginv, axis=1, keepdims=True),          # 3
        jnp.sum(Ginv, axis=1, keepdims=True),              # 4
        jnp.sum(inv, axis=1, keepdims=True),               # 5
        jnp.sum(F * F * inv, axis=1, keepdims=True),       # 6
        jnp.sum(A, axis=1, keepdims=True),                 # 7
        jnp.sum(Em, axis=1, keepdims=True),                # 8
        jnp.sum(Gm, axis=1, keepdims=True),                # 9
    ]
    Bsz = E.shape[0]
    colids = jax.lax.broadcasted_iota(jnp.int32, (Bsz, _OUT_W), 1)
    partial = jnp.zeros((Bsz, _OUT_W), jnp.float32)
    for k, s in enumerate(sums):          # static unroll, assembled in regs
        partial = jnp.where(colids == k, s, partial)

    @pl.when(t == 0)
    def _():
        out_ref[...] = jnp.zeros_like(out_ref)

    out_ref[...] = out_ref[...] + partial


def sciso_row_sums(fff, eps=1e-20, *, tms=2048):
    """fff: (B, M, 3) with last axis (E, F, G). Returns (B, 16) moment sums."""
    B, M, _ = fff.shape
    fff_t = jnp.transpose(fff.astype(jnp.float32), (0, 2, 1))    # (B, 3, M)
    TMS = min(tms, _round_up(M, 128))
    Mp = _round_up(M, TMS)
    n_t = Mp // TMS
    fff_pad = jnp.pad(fff_t, ((0, 0), (0, 0), (0, Mp - M)))
    return pl.pallas_call(
        functools.partial(_sciso_kernel, eps=float(eps), m_valid=M, tms=TMS),
        out_shape=jax.ShapeDtypeStruct((B, _OUT_W), jnp.float32),
        grid=(n_t,),
        in_specs=[pl.BlockSpec((B, 3, TMS), lambda t: (0, 0, t))],
        out_specs=pl.BlockSpec((B, _OUT_W), lambda t: (0, 0)),
        compiler_params=pltpu.CompilerParams(
            dimension_semantics=("arbitrary",),
            vmem_limit_bytes=32 * 1024 * 1024),
    )(fff_pad)


# ---------------------------------------------------------------------------
# Python-side module mirroring MultipatchDecoder's compute.
# ---------------------------------------------------------------------------
class MultipatchDecoderPallas:
    def __init__(self, M, num_patches, alpha_chd=1.0, loss_scaled_isometry=False,
                 alpha_scaled_isometry=0.0, alphas_sciso=None):
        self._num_patches = num_patches
        self._spp = M // num_patches
        self._M = self._spp * num_patches
        self._alpha_chd = float(alpha_chd)
        self._loss_scaled_isometry = loss_scaled_isometry
        self._alpha_scaled_isometry = float(alpha_scaled_isometry)
        self._alphas_si = {k: float(v) for k, v in (alphas_sciso or {}).items()}
        self._eps = 1e-20
        # No learnable parameters in this (abstract decoder-base) module.
        self.pc_pred = None       # (B, M, 3)
        self.geom_props = None    # {'fff': (B, M, 3)} with last axis = (E, F, G)

    # TODO(synk): forward() is abstract in the PyTorch module (NotImplementedError);
    # only the loss path is implemented here.

    def echd(self, pc_gt, pc_p):
        d_p2gt, d_gt2p = chamfer_min_dists(pc_gt, pc_p)   # hot path in Pallas
        return jnp.mean(d_p2gt) + jnp.mean(d_gt2p)

    def loss_clps_olap(self, areas):
        B = self.pc_pred.shape[0]
        fff = self.geom_props['fff'].reshape(B, self._M, 3)
        s = sciso_row_sums(fff, eps=self._eps)                   # (B, 16), one pass
        n = float(B * self._M)
        a = self._alphas_si

        sum_inv = jnp.sum(s[:, 5])
        muE = jnp.sum(s[:, 8]) / n
        muG = jnp.sum(s[:, 9]) / n

        L_stretch = jnp.sum(s[:, 0]) / n * a['stretch']
        # mean((E - muE)^2 / (A2+eps)) expanded around the fused moment sums.
        L_E = (jnp.sum(s[:, 1]) - 2.0 * muE * jnp.sum(s[:, 2])
               + muE * muE * sum_inv) / n * a['E']
        L_G = (jnp.sum(s[:, 3]) - 2.0 * muG * jnp.sum(s[:, 4])
               + muG * muG * sum_inv) / n * a['G']
        L_F = jnp.sum(s[:, 6]) / n * a['skew']
        # A.mean(dim=2).sum(dim=1) == sum over all points of A / spp
        A_tot = s[:, 7] / float(self._spp)                       # (B,)
        A_gt = areas * a['total_area_mult']
        L_Atot = jnp.mean(jnp.maximum(0.0, A_tot - A_gt) ** 2) * a['total_area']
        loss_sciso = L_F + L_E + L_G + L_stretch + L_Atot
        return {'L_skew': L_F, 'L_E': L_E, 'L_G': L_G, 'L_stretch': L_stretch,
                'L_Atot': L_Atot, 'loss_sciso': loss_sciso}

    def loss(self, pc_gt, areas_gt=None):
        losses = {}
        loss_chd = self.echd(pc_gt, self.pc_pred)
        losses['loss_chd'] = loss_chd
        losses['loss_tot'] = loss_chd * self._alpha_chd
        loss_sciso = jnp.asarray(0.0, jnp.float32)
        if self._loss_scaled_isometry:
            losses_sciso = self.loss_clps_olap(areas_gt)
            losses.update(losses_sciso)
            loss_sciso = losses_sciso['loss_sciso']
        losses['loss_tot'] = losses['loss_tot'] + self._alpha_scaled_isometry * loss_sciso
        return losses


if __name__ == "__main__":
    key = jax.random.PRNGKey(0)
    B, N = 2, 128
    num_patches, spp = 4, 32
    M = num_patches * spp           # 128 sampled points total

    k1, k2, k3, k4 = jax.random.split(key, 4)
    pc_gt = jax.random.normal(k1, (B, N, 3), jnp.float32)
    pc_pred = jax.random.normal(k2, (B, M, 3), jnp.float32)
    fff = jax.random.uniform(k3, (B, M, 3), jnp.float32, minval=0.1, maxval=2.0)
    areas_gt = jax.random.uniform(k4, (B,), jnp.float32, minval=1.0, maxval=2.0)

    dec = MultipatchDecoderPallas(
        M=M, num_patches=num_patches, alpha_chd=1.0,
        loss_scaled_isometry=True, alpha_scaled_isometry=0.1,
        alphas_sciso={'stretch': 1.0, 'E': 1.0, 'G': 1.0, 'skew': 1.0,
                      'total_area_mult': 1.0, 'total_area': 1.0})
    dec.pc_pred = pc_pred
    dec.geom_props = {'fff': fff}

    losses = dec.loss(pc_gt, areas_gt=areas_gt)
    jax.block_until_ready(losses['loss_tot'])
    print("KERNEL_OK")
</pallas_src>

<mosaic_0001>
module attributes {stable_mosaic.version = 11 : i64} {
  func.func @_chamfer_kernel(%arg0: i32, %arg1: i32, %arg2: i32, %arg3: memref<1x128x8xf32, #tpu.memory_space<vmem>>, %arg4: memref<1x8x128xf32, #tpu.memory_space<vmem>>, %arg5: memref<1x1x128xf32, #tpu.memory_space<vmem>>, %arg6: memref<1x1x1x128xf32, #tpu.memory_space<vmem>>, %arg7: memref<128x128xf32, #tpu.memory_space<vmem>>) attributes {dimension_semantics = [#tpu.dimension_semantics<parallel>, #tpu.dimension_semantics<parallel>, #tpu.dimension_semantics<arbitrary>], iteration_bounds = array<i64: 2, 1, 1>, scalar_prefetch = 0 : i64, scratch_operands = 1 : i64, tpu.core_type = #tpu.core_type<tc>, window_params = [{transform_indices = @transform_0, window_bounds = array<i64: 1, 128, 8>}, {transform_indices = @transform_1, window_bounds = array<i64: 1, 8, 128>}, {transform_indices = @transform_2, window_bounds = array<i64: 1, 1, 128>}, {transform_indices = @transform_3, window_bounds = array<i64: 1, 1, 1, 128>}]} {
    %c0 = arith.constant 0 : index
    %c0_0 = arith.constant 0 : index
    %c0_1 = arith.constant 0 : index
    %0 = vector.load %arg3[%c0, %c0_0, %c0_1] : memref<1x128x8xf32, #tpu.memory_space<vmem>>, vector<1x128x8xf32>
    %1 = vector.shape_cast %0 : vector<1x128x8xf32> to vector<128x8xf32>
    %c0_2 = arith.constant 0 : index
    %c0_3 = arith.constant 0 : index
    %c0_4 = arith.constant 0 : index
    %2 = vector.load %arg4[%c0_2, %c0_3, %c0_4] : memref<1x8x128xf32, #tpu.memory_space<vmem>>, vector<1x8x128xf32>
    %3 = vector.shape_cast %2 : vector<1x8x128xf32> to vector<8x128xf32>
    %cst = arith.constant dense<0.000000e+00> : vector<128x128xf32>
    %4 = tpu.matmul %1, %3, %cst {dimension_numbers = #tpu.dot_dimension_numbers<[1], [0], [0], [1], [0, 0, 1, 1], [], []>} : vector<128x8xf32>, vector<8x128xf32>, vector<128x128xf32> -> vector<128x128xf32>
    %cst_5 = arith.constant dense<0x7F800000> : vector<128xf32>
    %5 = vector.multi_reduction <minimumf>, %4, %cst_5 [0] : vector<128x128xf32> to vector<128xf32>
    %c0_6 = arith.constant 0 : index
    %c0_7 = arith.constant 0 : index
    %c0_8 = arith.constant 0 : index
    %c0_9 = arith.constant 0 : index
    %6 = vector.load %arg6[%c0_6, %c0_7, %c0_8, %c0_9] : memref<1x1x1x128xf32, #tpu.memory_space<vmem>>, vector<1x1x1x128xf32>
    %7 = vector.shape_cast %6 : vector<1x1x1x128xf32> to vector<128xf32>
    %8 = vector.shape_cast %5 : vector<128xf32> to vector<1x1x1x128xf32>
    tpu.vector_store %arg6[%c0_6, %c0_7, %c0_8, %c0_9], %8 {strides = array<i32>} : memref<1x1x1x128xf32, #tpu.memory_space<vmem>>, vector<1x1x1x128xf32>,
    %c0_i32 = arith.constant 0 : i32
    %9 = arith.cmpi eq, %arg2, %c0_i32 : i32
    %10 = arith.extui %9 : i1 to i32
    %c0_i32_10 = arith.constant 0 : i32
    %11 = arith.cmpi ne, %10, %c0_i32_10 : i32
    scf.if %11 {
      %c0_15 = arith.constant 0 : index
      %c0_16 = arith.constant 0 : index
      %18 = vector.load %arg7[%c0_15, %c0_16] : memref<128x128xf32, #tpu.memory_space<vmem>>, vector<128x128xf32>
      tpu.vector_store %arg7[%c0_15, %c0_16], %4 {strides = array<i32>} : memref<128x128xf32, #tpu.memory_space<vmem>>, vector<128x128xf32>,
    } else {
    }
    %c0_i32_11 = arith.constant 0 : i32
    %12 = arith.cmpi ne, %arg2, %c0_i32_11 : i32
    %13 = arith.extui %12 : i1 to i32
    %c0_i32_12 = arith.constant 0 : i32
    %14 = arith.cmpi ne, %13, %c0_i32_12 : i32
    scf.if %14 {
      %c0_15 = arith.constant 0 : index
      %c0_16 = arith.constant 0 : index
      %18 = vector.load %arg7[%c0_15, %c0_16] : memref<128x128xf32, #tpu.memory_space<vmem>>, vector<128x128xf32>
      %19 = arith.minimumf %18, %4 : vector<128x128xf32>
      %c0_17 = arith.constant 0 : index
      %c0_18 = arith.constant 0 : index
      %20 = vector.load %arg7[%c0_17, %c0_18] : memref<128x128xf32, #tpu.memory_space<vmem>>, vector<128x128xf32>
      tpu.vector_store %arg7[%c0_17, %c0_18], %19 {strides = array<i32>} : memref<128x128xf32, #tpu.memory_space<vmem>>, vector<128x128xf32>,
    } else {
    }
    %c0_i32_13 = arith.constant 0 : i32
    %15 = arith.cmpi eq, %arg2, %c0_i32_13 : i32
    %16 = arith.extui %15 : i1 to i32
    %c0_i32_14 = arith.constant 0 : i32
    %17 = arith.cmpi ne, %16, %c0_i32_14 : i32
    scf.if %17 {
      %c0_15 = arith.constant 0 : index
      %c0_16 = arith.constant 0 : index
      %18 = vector.load %arg7[%c0_15, %c0_16] : memref<128x128xf32, #tpu.memory_space<vmem>>, vector<128x128xf32>
      %cst_17 = arith.constant dense<0x7F800000> : vector<128xf32>
      %19 = vector.multi_reduction <minimumf>, %18, %cst_17 [1] : vector<128x128xf32> to vector<128xf32>
      %c0_18 = arith.constant 0 : index
      %c0_19 = arith.constant 0 : index
      %c0_20 = arith.constant 0 : index
      %20 = vector.load %arg5[%c0_18, %c0_19, %c0_20] : memref<1x1x128xf32, #tpu.memory_space<vmem>>, vector<1x1x128xf32>
      %21 = vector.shape_cast %20 : vector<1x1x128xf32> to vector<128xf32>
      %22 = vector.shape_cast %19 : vector<128xf32> to vector<1x1x128xf32>
      tpu.vector_store %arg5[%c0_18, %c0_19, %c0_20], %22 {strides = array<i32>} : memref<1x1x128xf32, #tpu.memory_space<vmem>>, vector<1x1x128xf32>,
    } else {
    }
    return
  }
  func.func @transform_0(%arg0: i32, %arg1: i32, %arg2: i32) -> (i32, i32, i32) {
    %c0_i32 = arith.constant 0 : i32
    %c0_i32_0 = arith.constant 0 : i32
    return %arg0, %arg1, %c0_i32 : i32, i32, i32
  }
  func.func @transform_1(%arg0: i32, %arg1: i32, %arg2: i32) -> (i32, i32, i32) {
    %c0_i32 = arith.constant 0 : i32
    %c0_i32_0 = arith.constant 0 : i32
    return %arg0, %c0_i32, %arg2 : i32, i32, i32
  }
  func.func @transform_2(%arg0: i32, %arg1: i32, %arg2: i32) -> (i32, i32, i32) {
    %c0_i32 = arith.constant 0 : i32
    %c0_i32_0 = arith.constant 0 : i32
    return %arg0, %c0_i32, %arg1 : i32, i32, i32
  }
  func.func @transform_3(%arg0: i32, %arg1: i32, %arg2: i32) -> (i32, i32, i32, i32) {
    %c0_i32 = arith.constant 0 : i32
    %c0_i32_0 = arith.constant 0 : i32
    return %arg0, %arg1, %c0_i32, %arg2 : i32, i32, i32, i32
  }
}

</mosaic_0001>

<bundles_post_ra>
// kernel: tpu_custom_call.1
= control target key start
LH: loop header
LB: loop body
LE: loop exit
PB: predicated region body
PF: predicated region fallthrough
CT: control target
= control target key end

     0   :  { %9 = vsyncpa [#allocation4], 0  ;;  %s1338_s0 = inlined_call_operand.vmem [shape: f32[2,128,8], index: 0, kind: input, shape index: {}]   ;;  %s1339_s1 = inlined_call_operand.vmem [shape: f32[2,8,128], index: 1, kind: input, shape index: {}]   ;;  %s1340_s2 = inlined_call_operand.hbm [shape: f32[2,1,128], index: 2, kind: output, shape index: {0}]   ;;  %s1341_s3 = inlined_call_operand.hbm [shape: f32[2,1,1,128], index: 3, kind: output, shape index: {1}]  }
   0x1   :  { %11 = vsyncpa [#allocation4 + $0x1], 0 }
   0x2   :  { %12 = vsyncpa [#allocation6], 0 }
   0x3   :  { %14 = vsyncpa [#allocation6 + $0x1], 0  ;;  %s1147_s12 = smov 0   ;;  %s1149_s13 = smov 0  }
   0x4   :  { %s1151_s14 = smov 0   ;;  %s1153_s15 = smov 0  }
   0x5   :  { %s1155_s16 = smov 0   ;;  %s1157_s17 = smov 0  }
   0x6 LB: > { %s883_s18 = sadd.s32 4294967295, %s1123_s17   ;;  %s884_s19 = sadd.s32 4294967294, %s1123_s17   ;;  %s1123_s17 = sphi %s1157_s17, %s20_s17   ;;  %s1119_s16 = sphi %s1155_s16, %s1348_s16   ;;  %s1115_s15 = sphi %s1153_s15, %s1347_s15   ;;  %s1111_s14 = sphi %s1151_s14, %s1346_s14   ;;  %s1107_s13 = sphi %s1149_s13, %s1345_s13   ;;  %s1103_s12 = sphi %s1147_s12, %s1344_s12  }
   0x7   : > { %s39_s20 = sadd.s32 1, %s1119_s16  ;;  %s104_s21 = sadd.s32 1, %s1111_s14 }
   0x8   : > { %p41_p0 = scmp.ge.s32.totalorder %s39_s20, 2  ;;  %p114_p1 = scmp.ne.s32.totalorder %s1111_s14, %s1107_s13 }
   0x9   : > { %p115_p2 = scmp.eq.s32.totalorder %s883_s18, 1  ;;  %p120_p3 = scmp.ne.s32.totalorder %s1107_s13, %s1103_s12 }
   0xa   : > { %s1350_s20 = smov (%p41_p0, %s39_s20), 0  ;;  %p121_p5 = scmp.eq.s32.totalorder %s884_s19, 1 }
   0xb   : > { %p1187_p4 = por %p115_p2, %p114_p1  ;;  %s99_s23 = ssub.s32 %s1119_s16, %s1350_s20 }
   0xc   : > { %p887_p6 = scmp.ge.s32.totalorder %s1123_s17, 1  ;;  %p102_p7 = scmp.eq.s32.totalorder %s99_s23, 0 }
   0xd   : > { %p1194_p8 = por %p121_p5, %p120_p3  ;;  %p192_p9 = scmp.lt.s32.totalorder %s1123_s17, 3 }
   0xe   : > { %s1200_s25 = scalar_select %p102_p7, %s1111_s14, %s104_s21  }
   0xf   : > { %p193_p10 = pnand %p887_p6, %p192_p9 }
  0x10   : > { %p231_p11 = scmp.lt.s32.totalorder (!%p193_p10), %s1115_s15, 1  ;;  %s1245_s8 = sand.u32 (!%p193_p10), 1, %s1107_s13  }
  0x11   : > { %196 = sbr.rel (%p193_p10) target bundleno = 406 (0x196), region = 28  ;;  %s229_s9 = scalar_lea.vmem (!%p193_p10), [#allocation5], %s1245_s8 }
  0x12   : > { %s907_s10 = sshll.u32 (!%p193_p10), %s1115_s15, 4  ;;  %s765_s21 = sshll.u32 (!%p193_p10), %s229_s9, 4  ;;  %s766_s21 = int_to_ptr.vmem [resolvable:$true] %s765_s21 }
  0x13   : > { %s763_s19 = scalar_lea.hbm (!%p193_p10), %s1341_s3, %s907_s10  ;;  %s737_s23 = scalar_lea.sflag (!%p193_p10), [#allocation6], %s1245_s8 }
  0x16   : > { %s232_s26 = scalar_select %p231_p11, %s1115_s15, 1  ;;  %vm264_vm0 = vcmask 64512  }
  0x18   : > { %s911_s27 = sshll.u32 %s232_s26, 7  ;;  %s890_s28 = sshll.u32 %s232_s26, 3 }
  0x19   : > { %s1207_s4 = scalar_lea.vmem %s1338_s0, %s911_s27  ;;  %s246_s7 = scalar_lea.vmem %s1339_s1, %s890_s28 }
  0x1a   : > { %v263_v0 = vld [vmem:[%s246_s7] sm:$0xff]  ;;  %v248_v3 = vld [vmem:[%s1207_s4 + $0x8] sm:$0xff]  ;;  %v249_v5 = vld [vmem:[%s1207_s4 + $0x10] sm:$0xff]  ;;  %s1017_s26 = scalar_lea.vmem %s766_s21, 16  ;;  %s1125_s27 = smov [#allocation5]  }
  0x1b   : > { %v247_v1 = vld [vmem:[%s1207_s4] sm:$0xff]  ;;  %929 = vmatprep.subr.mxu0 %v263_v0  ;;  %955 = vmatprep.subr.mxu1 %v263_v0  ;;  %v256_v4 = vld [vmem:[%s1207_s4 + $0x48] sm:$0xff]  ;;  %v257_v6 = vld [vmem:[%s1207_s4 + $0x50] sm:$0xff]  ;;  %p1018_p12 = scmp.ne.s32.totalorder %s766_s21, %s1017_s26  ;;  %s1021_s28 = sshll.u32 %s1125_s27, 4  ;;  %s1022_s28 = int_to_ptr.vmem [resolvable:$false] %s1021_s28 }
  0x1c   : > { %v255_v2 = vld [vmem:[%s1207_s4 + $0x40] sm:$0xff]  ;;  %930 = vmatpush3.msra.mxu0 %v263_v0  ;;  %956 = vmatpush3.msra.mxu1 %v263_v0  ;;  %v250_v7 = vld [vmem:[%s1207_s4 + $0x18] sm:$0xff]  ;;  %v252_v11 = vld [vmem:[%s1207_s4 + $0x28] sm:$0xff]  ;;  %s1023_s29 = scalar_lea.vmem %s1022_s28, 32  ;;  %p1024_p1 = scmp.lt.s32.totalorder %s766_s21, %s1022_s28 }
  0x1d   : > { %931 = vmatprep.mubr.msk.f32.mxu0 %vm264_vm0, %v247_v1  ;;  %943 = vmatprep.mubr.msk.f32.mxu1 %vm264_vm0, %v255_v2  ;;  %v258_v8 = vld [vmem:[%s1207_s4 + $0x58] sm:$0xff]  ;;  %v251_v9 = vld [vmem:[%s1207_s4 + $0x20] sm:$0xff]  ;;  %v260_v12 = vld [vmem:[%s1207_s4 + $0x68] sm:$0xff]  ;;  %p1019_p13 = pnand %p1018_p12, %p1187_p4  ;;  %p1025_p2 = scmp.lt.s32.totalorder %s1023_s29, %s1017_s26 }
  0x1e   : > { %932 = vmatmul.mubr.msk.f32.vlgmr.msra.gmra.mxu0 %vm264_vm0, %v248_v3  ;;  %944 = vmatmul.mubr.msk.f32.vlgmr.msra.gmra.mxu1 %vm264_vm0, %v256_v4  ;;  %v259_v10 = vld [vmem:[%s1207_s4 + $0x60] sm:$0xff]  ;;  %v253_v13 = vld [vmem:[%s1207_s4 + $0x30] sm:$0xff]  ;;  %v254_v15 = vld [vmem:[%s1207_s4 + $0x38] sm:$0xff] }
  0x1f   : > { %934 = vmatprep.mubr.msk.f32.mxu0 %vm264_vm0, %v249_v5  ;;  %946 = vmatprep.mubr.msk.f32.mxu1 %vm264_vm0, %v257_v6  ;;  %v261_v14 = vld [vmem:[%s1207_s4 + $0x70] sm:$0xff]  ;;  %v262_v16 = vld [vmem:[%s1207_s4 + $0x78] sm:$0xff]  ;;  %p1020_p0 = pneg %p1019_p13  ;;  %p1026_p3 = por %p1025_p2, %p1024_p1 }
  0x21   : > { %p1027_p5 = pnand %p1026_p3, %p1020_p0 }
  0x22   : > { %935 = vmatmul.mubr.msk.f32.gmra.mxu0 %vm264_vm0, %v250_v7  ;;  %947 = vmatmul.mubr.msk.f32.gmra.mxu1 %vm264_vm0, %v258_v8 }
  0x23   : > { %937 = vmatprep.mubr.msk.f32.mxu0 %vm264_vm0, %v251_v9  ;;  %949 = vmatprep.mubr.msk.f32.mxu1 %vm264_vm0, %v259_v10 }
  0x26   : > { %938 = vmatmul.mubr.msk.f32.gmra.mxu0 %vm264_vm0, %v252_v11  ;;  %950 = vmatmul.mubr.msk.f32.gmra.mxu1 %vm264_vm0, %v260_v12 }
  0x27   : > { %940 = vmatprep.mubr.msk.f32.mxu0 %vm264_vm0, %v253_v13  ;;  %952 = vmatprep.mubr.msk.f32.mxu1 %vm264_vm0, %v261_v14 }
  0x2a   : > { %941 = vmatmul.mubr.msk.f32.gmra.mxu0 %vm264_vm0, %v254_v15  ;;  %953 = vmatmul.mubr.msk.f32.gmra.mxu1 %vm264_vm0, %v262_v16 }
  0xde   : > { %v933_v17 = vpop.f32.mrf.mxu0  ;;  %v945_v18 = vpop.f32.mrf.mxu1 }
  0xdf   : > { %589 = vmin.xlane.f32.xlu1 %v945_v18  ;;  %573 = vmin.xlane.f32.xlu0 %v933_v17 }
  0xe0   : > { %v379_v19 = vpop.f32.mrf.mxu0  ;;  %v419_v20 = vpop.f32.mrf.mxu1 }
  0xe2   : > { %v936_v21 = vpop.f32.mrf.mxu0  ;;  %v948_v22 = vpop.f32.mrf.mxu1 }
  0xe3   : > { %571 = vmin.xlane.f32.xlu0 %v379_v19  ;;  %577 = vmin.xlane.f32.xlu1 %v936_v21 }
  0xe4   : > { %v389_v23 = vpop.f32.mrf.mxu0  ;;  %v429_v24 = vpop.f32.mrf.mxu1 }
  0xe6   : > { %v939_v25 = vpop.f32.mrf.mxu0  ;;  %v951_v26 = vpop.f32.mrf.mxu1 }
  0xe7   : > { %587 = vmin.xlane.f32.xlu0 %v419_v20  ;;  %593 = vmin.xlane.f32.xlu1 %v948_v22  ;;  %v459_v29 = vmin.f32 %v933_v17, %v939_v25 }
  0xe8   : > { %v399_v27 = vpop.f32.mrf.mxu0  ;;  %v439_v28 = vpop.f32.mrf.mxu1 }
  0xe9   : > { %v458_v30 = vmin.f32 %v379_v19, %v399_v27  ;;  %v463_v36 = vmin.f32 %v459_v29, %v945_v18 }
  0xea   : > { %v942_v31 = vpop.f32.mrf.mxu0  ;;  %v954_v32 = vpop.f32.mrf.mxu1 }
  0xeb   : > { %v461_v33 = vmin.f32 %v936_v21, %v942_v31  ;;  %591 = vmin.xlane.f32.xlu0 %v429_v24  ;;  %575 = vmin.xlane.f32.xlu1 %v389_v23  ;;  %v462_v34 = vmin.f32 %v458_v30, %v419_v20  ;;  %v467_v42 = vmin.f32 %v463_v36, %v951_v26 }
  0xec   : > { %v409_v35 = vpop.f32.mrf.mxu0  ;;  %v449_v39 = vpop.f32.mrf.mxu1 }
  0xed   : > { %v460_v37 = vmin.f32 %v389_v23, %v409_v35  ;;  %v465_v38 = vmin.f32 %v461_v33, %v948_v22  ;;  %v466_v40 = vmin.f32 %v462_v34, %v439_v28 }
  0xef   : > { %581 = vmin.xlane.f32.xlu1 %v939_v25  ;;  %579 = vmin.xlane.f32.xlu0 %v399_v27  ;;  %v464_v41 = vmin.f32 %v460_v37, %v429_v24  ;;  %v469_v43 = vmin.f32 %v465_v38, %v954_v32  ;;  %v470_v45 = vmin.f32 %v466_v40, %v467_v42 }
  0xf1   : > { %v468_v44 = vmin.f32 %v464_v41, %v449_v39 }
  0xf3   : > { %v471_v46 = vmin.f32 %v468_v44, %v469_v43  ;;  %585 = vmin.xlane.f32.xlu1 %v942_v31  ;;  %583 = vmin.xlane.f32.xlu0 %v409_v35 }
  0xf5   : > { %v472_v47 = vmin.f32 %v470_v45, %v471_v46 }
  0xf7   : > { %v473_v48 = vrot.slane %v472_v47, 4  ;;  %597 = vmin.xlane.f32.xlu1 %v951_v26  ;;  %595 = vmin.xlane.f32.xlu0 %v439_v28 }
  0xf9   : > { %v474_v49 = vmin.f32 %v472_v47, %v473_v48 }
  0xfb   : > { %v475_v50 = vrot.slane %v474_v49, 2  ;;  %601 = vmin.xlane.f32.xlu1 %v954_v32  ;;  %599 = vmin.xlane.f32.xlu0 %v449_v39 }
  0xfd   : > { %v476_v51 = vmin.f32 %v474_v49, %v475_v50 }
  0xff   : > { %v477_v52 = vrot.slane %v476_v51, 1 }
 0x101   : > { %v478_v53 = vmin.f32 %v476_v51, %v477_v52 }
 0x103   : > { %479 = vst [vmem:[%s229_s9] sm:$0x1] %v478_v53 }
 0x104   : > { %1030 = shalt.err (!%p1027_p5)
}
 0x105   : > { %s1031_s30 = scalar_lea.hbm %s763_s19, 16  ;;  %s1035_s6 = scalar_lea.hbm %s1341_s3, 32 }
 0x106   : > { %p1032_p6 = scmp.ne.s32.totalorder %s763_s19, %s1031_s30  ;;  %p1036_p10 = scmp.lt.s32.totalorder %s763_s19, %s1341_s3 }
 0x107   : > { %p1037_p11 = scmp.lt.s32.totalorder %s1035_s6, %s1031_s30 }
 0x108   : > { %p1033_p7 = pnand %p1032_p6, %p1187_p4 }
 0x109   : > { %p1038_p12 = por %p1037_p11, %p1036_p10 }
 0x10a   : > { %p1034_p9 = pneg %p1033_p7 }
 0x10c   : > { %p1039_p13 = pnand %p1038_p12, %p1034_p9 }
 0x10e   : > { %1042 = shalt.err (!%p1039_p13)
}
 0x10f   : > { %958 = dma.vmem_to_hbm [thread:$0]  (%p1187_p4), %s766_s21, 16, %s763_s19, %s737_s23   ;;  %v619_v54 = vlaneseq  ;;  %vm630_vm1 = vcmask 130112   ;;  %vm637_vm2 = vcmask 195712   ;;  %vm644_vm3 = vcmask 261312  }
 0x110   : > { %vm651_vm4 = vcmask 326912   ;;  %vm658_vm5 = vcmask 392512   ;;  %vm665_vm6 = vcmask 458112   ;;  %vm672_vm7 = vcmask 523712   ;;  %s223_s11 = scalar_lea.vmem [#allocation3], %s1245_s8  ;;  %s1297_s23 = scalar_lea.hbm %s1340_s2, %s907_s10 }
 0x111   : > { %v620_v55 = vand.u32 127, %v619_v54  ;;  %v1269_v58 = vshrl.u32 %v619_v54, 7  ;;  %vm679_vm8 = vcmask 589312   ;;  %vm686_vm9 = vcmask 654912   ;;  %s750_s18 = sshll.u32 %s223_s11, 4  ;;  %s733_s26 = scalar_lea.sflag [#allocation4], %s1245_s8  ;;  %s751_s18 = int_to_ptr.vmem [resolvable:$true] %s750_s18 }
 0x112   : > { %vm693_vm10 = vcmask 720512   ;;  %vm700_vm11 = vcmask 786112   ;;  %vm707_vm12 = vcmask 851712   ;;  %vm714_vm13 = vcmask 917312   ;;  %s1043_s27 = scalar_lea.vmem %s751_s18, 16  ;;  %s1126_s28 = smov [#allocation3]  }
 0x113   : > { %v625_v59 = vadd.s32 4294967288, %v620_v55  ;;  %v632_v62 = vadd.s32 4294967280, %v620_v55  ;;  %v623_v63 = vsub.s32 %v620_v55, %v1269_v58  ;;  %v639_v1 = vadd.s32 4294967272, %v620_v55  ;;  %p1044_p0 = scmp.ne.s32.totalorder %s751_s18, %s1043_s27  ;;  %s1047_s29 = sshll.u32 %s1126_s28, 4  ;;  %s1048_s29 = int_to_ptr.vmem [resolvable:$false] %s1047_s29 }
 0x114   : > { %v646_v5 = vadd.s32 4294967264, %v620_v55  ;;  %v653_v7 = vadd.s32 4294967256, %v620_v55  ;;  %v667_v14 = vadd.s32 4294967240, %v620_v55  ;;  %v660_v15 = vadd.s32 4294967248, %v620_v55  ;;  %s1049_s30 = scalar_lea.vmem %s1048_s29, 32  ;;  %p1050_p3 = scmp.lt.s32.totalorder %s751_s18, %s1048_s29 }
 0x115   : > { %v628_v0 = vsub.s32 %v625_v59, %v1269_v58  ;;  %v635_v4 = vsub.s32 %v632_v62, %v1269_v58  ;;  %v642_v9 = vsub.s32 %v639_v1, %v1269_v58  ;;  %v674_v18 = vadd.s32 4294967232, %v620_v55  ;;  %p1045_p1 = pnand %p1044_p0, %p1187_p4  ;;  %p1051_p5 = scmp.lt.s32.totalorder %s1049_s30, %s1043_s27 }
 0x116   : > { %v649_v13 = vsub.s32 %v646_v5, %v1269_v58  ;;  %v656_v17 = vsub.s32 %v653_v7, %v1269_v58  ;;  %v681_v20 = vadd.s32 4294967224, %v620_v55  ;;  %v688_v22 = vadd.s32 4294967216, %v620_v55 }
 0x117   : > { %v670_v26 = vsub.s32 %v667_v14, %v1269_v58  ;;  %v663_v27 = vsub.s32 %v660_v15, %v1269_v58  ;;  %v695_v28 = vadd.s32 4294967208, %v620_v55  ;;  %v709_v31 = vadd.s32 4294967192, %v620_v55  ;;  %p1046_p2 = pneg %p1045_p1  ;;  %p1052_p6 = por %p1051_p5, %p1050_p3 }
 0x118   : > { %v677_v32 = vsub.s32 %v674_v18, %v1269_v58  ;;  %v702_v34 = vadd.s32 4294967200, %v620_v55  ;;  %v684_v35 = vsub.s32 %v681_v20, %v1269_v58  ;;  %v691_v36 = vsub.s32 %v688_v22, %v1269_v58 }
 0x119   : > { %v723_v41 = vadd.s32 4294967176, %v620_v55  ;;  %v716_v42 = vadd.s32 4294967184, %v620_v55  ;;  %v698_v43 = vsub.s32 %v695_v28, %v1269_v58  ;;  %v712_v45 = vsub.s32 %v709_v31, %v1269_v58  ;;  %p1053_p7 = pnand %p1052_p6, %p1046_p2 }
 0x11a   : > { %v705_v48 = vsub.s32 %v702_v34, %v1269_v58  ;;  %vm721_vm14 = vcmask 982912   ;;  %vm728_vm15 = vcmask 1048512  }
 0x11b   : > { %v726_v55 = vsub.s32 %v723_v41, %v1269_v58 }
 0x168   : > { %v1267_v56 = vpop.xlane.xlu1 %589  ;;  %v574_v57 = vpop.xlane.xlu0 %573 }
 0x169   : > { %v629_v8 = vrot.slane %v574_v57, %v628_v0  ;;  %v685_v49 = vrot.slane %v1267_v56, %v684_v35  ;;  %v719_v57 = vsub.s32 %v716_v42, %v1269_v58 }
 0x16c   : > { %v572_v60 = vpop.xlane.xlu0 %571  ;;  %v578_v61 = vpop.xlane.xlu1 %577 }
 0x16d   : > { %v624_v6 = vrot.slane %v572_v60, %v623_v63  ;;  %v643_v21 = vrot.slane %v578_v61, %v642_v9 }
 0x16f   : > { %v631_v16 = vsel %vm630_vm1, %v629_v8, %v624_v6 }
 0x170   : > { %v588_v2 = vpop.xlane.xlu0 %587  ;;  %v1273_v3 = vpop.xlane.xlu1 %593 }
 0x171   : > { %v678_v46 = vrot.slane %v588_v2, %v677_v32  ;;  %v699_v59 = vrot.slane %v1273_v3, %v698_v43 }
 0x174   : > { %v592_v10 = vpop.xlane.xlu0 %591  ;;  %v576_v11 = vpop.xlane.xlu1 %575 }
 0x175   : > { %v636_v12 = vrot.slane %v576_v11, %v635_v4  ;;  %v692_v53 = vrot.slane %v592_v10, %v691_v36 }
 0x177   : > { %v638_v19 = vsel %vm637_vm2, %v636_v12, %v631_v16 }
 0x178   : > { %v582_v23 = vpop.xlane.xlu1 %581  ;;  %v580_v24 = vpop.xlane.xlu0 %579  ;;  %v645_v30 = vsel %vm644_vm3, %v643_v21, %v638_v19 }
 0x179   : > { %v650_v25 = vrot.slane %v580_v24, %v649_v13  ;;  %v657_v29 = vrot.slane %v582_v23, %v656_v17 }
 0x17b   : > { %v652_v33 = vsel %vm651_vm4, %v650_v25, %v645_v30 }
 0x17c   : > { %v586_v37 = vpop.xlane.xlu1 %585  ;;  %v584_v38 = vpop.xlane.xlu0 %583  ;;  %v659_v44 = vsel %vm658_vm5, %v657_v29, %v652_v33 }
 0x17d   : > { %v671_v39 = vrot.slane %v586_v37, %v670_v26  ;;  %v664_v40 = vrot.slane %v584_v38, %v663_v27 }
 0x17f   : > { %v666_v47 = vsel %vm665_vm6, %v664_v40, %v659_v44 }
 0x180   : > { %v673_v50 = vsel %vm672_vm7, %v671_v39, %v666_v47  ;;  %v598_v51 = vpop.xlane.xlu1 %597  ;;  %v596_v52 = vpop.xlane.xlu0 %595 }
 0x181   : > { %v680_v54 = vsel %vm679_vm8, %v678_v46, %v673_v50  ;;  %v706_v62 = vrot.slane %v596_v52, %v705_v48  ;;  %v713_v56 = vrot.slane %v598_v51, %v712_v45 }
 0x182   : > { %v687_v60 = vsel %vm686_vm9, %v685_v49, %v680_v54 }
 0x183   : > { %v694_v61 = vsel %vm693_vm10, %v692_v53, %v687_v60 }
 0x184   : > { %v701_v63 = vsel %vm700_vm11, %v699_v59, %v694_v61  ;;  %v602_v0 = vpop.xlane.xlu1 %601  ;;  %v600_v1 = vpop.xlane.xlu0 %599 }
 0x185   : > { %v708_v2 = vsel %vm707_vm12, %v706_v62, %v701_v63  ;;  %v727_v4 = vrot.slane %v602_v0, %v726_v55  ;;  %v720_v58 = vrot.slane %v600_v1, %v719_v57 }
 0x186   : > { %v715_v3 = vsel %vm714_vm13, %v713_v56, %v708_v2 }
 0x187   : > { %v722_v5 = vsel %vm721_vm14, %v720_v58, %v715_v3 }
 0x188   : > { %v729_v6 = vsel %vm728_vm15, %v727_v4, %v722_v5 }
 0x189   : > { %731 = vst [vmem:[%s223_s11] sm:$0x1] %v729_v6 }
 0x18a   : > { %1056 = shalt.err (!%p1053_p7)
}
 0x18b   : > { %s1057_s15 = scalar_lea.hbm %s1297_s23, 16  ;;  %s1061_s4 = scalar_lea.hbm %s1340_s2, 32 }
 0x18c   : > { %p1058_p9 = scmp.ne.s32.totalorder %s1297_s23, %s1057_s15  ;;  %p1062_p12 = scmp.lt.s32.totalorder %s1297_s23, %s1340_s2 }
 0x18d   : > { %p1063_p13 = scmp.lt.s32.totalorder %s1061_s4, %s1057_s15 }
 0x18e   : > { %p1059_p10 = pnand %p1058_p9, %p1187_p4 }
 0x18f   : > { %p1064_p0 = por %p1063_p13, %p1062_p12 }
 0x190   : > { %p1060_p11 = pneg %p1059_p10 }
 0x192   : > { %p1065_p1 = pnand %p1064_p0, %p1060_p11 }
 0x194   : > { %1068 = shalt.err (!%p1065_p1)
}
 0x195   : > { %957 = dma.vmem_to_hbm [thread:$0]  (%p1187_p4), %s751_s18, 16, %s1297_s23, %s733_s26  }
 0x196 PF: > { %p968_p2 = scmp.ge.s32.totalorder %s1123_s17, 2  ;;  %s777_s7 = sand.u32 1, %s1103_s12  }
 0x197   : > { %s778_s9 = scalar_lea.sflag [#allocation4], %s777_s7 }
 0x198   : > { %p962_p3 = pnand %p968_p2, %p1194_p8 }
 0x19a   : > { %p963_p5 = pneg %p962_p3 }
 0x19c   : > { %1094 = dma.done.wait (%p963_p5), %s778_s9, 16  }
 0x19d   : > { %1096 = vsyncadd (%p963_p5), %s778_s9, 4294967280  ;;  %s786_s11 = scalar_lea.sflag [#allocation6], %s777_s7 }
 0x19e   : > { %1098 = dma.done.wait (%p963_p5), %s786_s11, 16  }
 0x19f   : > { %1100 = vsyncadd (%p963_p5), %s786_s11, 4294967280  ;;  %s20_s17 = sadd.s32 1, %s1123_s17   ;;  %s1344_s12 = smov %s1107_s13 }
 0x1a0   : > { %p17_p6 = scmp.ge.s32.totalorder %s20_s17, 4   ;;  %s1345_s13 = smov %s1111_s14 }
 0x1a1   : > { %s1346_s14 = smov %s1200_s25  ;;  %s1347_s15 = smov %s1119_s16 }
 0x1a2   : > { %s1348_s16 = smov %s1350_s20  ;;  %19 = sbr.rel (!%p17_p6) target bundleno = 6 (0x6), region = 95 }
 0x1a7   :  { %790 = vsyncpa [#allocation4], 1 }
 0x1a8   :  { %792 = vsyncpa [#allocation4 + $0x1], 1 }
 0x1a9   :  { %793 = vsyncpa [#allocation6], 1 }
 0x1aa   :  { %795 = vsyncpa [#allocation6 + $0x1], 1 }

</bundles_post_ra>
